<compile_context>
chip_gen: v7x
topology: tpu7x:2x2x1
jax: 0.10.0
libtpu: 0.0.40
codegen_flags: <defaults>
</compile_context>

<pallas_src>
import jax
import jax.numpy as jnp
from jax import lax
from jax.experimental import pallas as pl
from jax.experimental.pallas import tpu as pltpu

STATE_SIZE, ACTION_SIZE, HIDDEN_SIZE = 4, 2, 32


def _round_up(x, m):
    return ((x + m - 1) // m) * m


def policy_kernel(x_ref, w1T_ref, b1_ref, w2T_ref, b2_ref, o_ref):
    """One batch tile, transposed [feature, batch] domain.

      x_ref   [TB, S]  bf16  (native layout; transposed on the MXU)
      w1T_ref [H, S]   f32   (constant index_map -> VMEM resident)
      b1_ref  [H, 1]   f32
      w2T_ref [A, H]   f32
      b2_ref  [A, 1]   f32
      o_ref   [A, TB]  f32   (lane-dense output slab)
    """
    x = x_ref[...].astype(jnp.float32)                 # bf16 stream -> f32 vregs
    # fc1 + ReLU: contract S on both operands -> [H, TB] (trans_b on the MXU).
    h = lax.dot_general(
        w1T_ref[...], x,
        dimension_numbers=(((1,), (1,)), ((), ())),
        preferred_element_type=jnp.float32)
    h = jnp.maximum(h + b1_ref[...], 0.0)              # [H,1] bias broadcasts over lanes
    # fc2: [A, H] @ [H, TB] -> [A, TB]
    logits = jnp.dot(w2T_ref[...], h,
                     preferred_element_type=jnp.float32) + b2_ref[...]
    # Softmax over the action axis (sublanes).
    m = jnp.max(logits, axis=0, keepdims=True)         # [1, TB]
    e = jnp.exp(logits - m)                            # [A, TB]
    denom = jnp.sum(e, axis=0, keepdims=True)          # [1, TB]
    inv = pl.reciprocal(denom, approx=False)           # exact: probs sum to 1
    o_ref[...] = (e * inv).astype(o_ref.dtype)         # lane-dense store


def _choose_batch_tiling(B):
    """Pick (TB, Bpad): lane-aligned batch tile and padded batch size."""
    bpad = _round_up(max(B, 1), 128)
    if bpad < 256:
        return bpad, bpad                      # single tile, grid=(1,)
    # >= 2 grid steps so v7x's two TensorCores both get work; keep tiles as
    # large as possible otherwise (per-grid-step overhead ~0.35us, VMEM is
    # never the constraint at (S+A)*TB*4 bytes per tile).
    tb = _round_up(pl.cdiv(bpad, 2), 128)
    tb = min(tb, 8192)
    return tb, _round_up(bpad, tb)


def _policy_forward_pallas_impl(x, kparams):
    w1T, b1c, w2T, b2c = kparams
    B, S = x.shape
    H = w1T.shape[0]
    A = w2T.shape[0]
    TB, Bpad = _choose_batch_tiling(B)

    # bf16 activation stream; cast + pad fuse into one copy under jit.
    x_pad = jnp.pad(x.astype(jnp.bfloat16), ((0, Bpad - B), (0, 0)))

    out_T = pl.pallas_call(
        policy_kernel,
        out_shape=jax.ShapeDtypeStruct((A, Bpad), jnp.float32),
        grid=(Bpad // TB,),
        in_specs=[
            pl.BlockSpec((TB, S), lambda i: (i, 0)),   # x: batch-tiled, native layout
            pl.BlockSpec((H, S), lambda i: (0, 0)),    # constant -> no re-DMA
            pl.BlockSpec((H, 1), lambda i: (0, 0)),
            pl.BlockSpec((A, H), lambda i: (0, 0)),
            pl.BlockSpec((A, 1), lambda i: (0, 0)),
        ],
        out_specs=pl.BlockSpec((A, TB), lambda i: (0, i)),  # last dim multiple of 128
        compiler_params=pltpu.CompilerParams(
            dimension_semantics=("parallel",)),        # shard batch tiles over TCs
    )(x_pad, w1T, b1c, w2T, b2c)

    # Slice + transpose stay inside the jit so XLA fuses them with the call.
    return out_T[:, :B].T


# Jitted Pallas path: everything (cast/pad/pallas/slice/transpose) is one program.
policy_forward_pallas = jax.jit(_policy_forward_pallas_impl)


@jax.jit
def _policy_forward_xla(x, kparams):
    """Fused pure-XLA path for tiny batches (dispatch-overhead bound)."""
    w1T, b1c, w2T, b2c = kparams
    h = jnp.maximum(x @ w1T.T + b1c[:, 0], 0.0)
    return jax.nn.softmax(h @ w2T.T + b2c[:, 0], axis=1)


def policy_forward(x, kparams, *, min_pallas_batch=256):
    """softmax(relu(x @ w1 + b1) @ w2 + b2, axis=1); x: [B, S] -> [B, A] f32."""
    if x.shape[0] < min_pallas_batch:
        return _policy_forward_xla(x, kparams)
    return policy_forward_pallas(x, kparams)


def prepare_kernel_params(w1, b1, w2, b2):
    """Cache kernel-layout params once (transposes off the hot path)."""
    return (jnp.asarray(w1, jnp.float32).T,                    # [H, S]
            jnp.reshape(b1, (-1, 1)).astype(jnp.float32),      # [H, 1]
            jnp.asarray(w2, jnp.float32).T,                    # [A, H]
            jnp.reshape(b2, (-1, 1)).astype(jnp.float32))      # [A, 1]


def init_params(key, state_size=4, hidden_size=32, action_size=2):
    # Deterministic init mimicking nn.Linear default (U(+/- 1/sqrt(fan_in))).
    k1, k2, k3, k4 = jax.random.split(key, 4)
    lim1 = 1.0 / (state_size ** 0.5)
    lim2 = 1.0 / (hidden_size ** 0.5)
    w1 = jax.random.uniform(k1, (state_size, hidden_size), jnp.float32, -lim1, lim1)
    b1 = jax.random.uniform(k2, (hidden_size,), jnp.float32, -lim1, lim1)
    w2 = jax.random.uniform(k3, (hidden_size, action_size), jnp.float32, -lim2, lim2)
    b2 = jax.random.uniform(k4, (action_size,), jnp.float32, -lim2, lim2)
    return w1, b1, w2, b2


if __name__ == "__main__":
    key = jax.random.PRNGKey(0)
    kx, kb, kp = jax.random.split(key, 3)

    batch, S, H, A = 2, STATE_SIZE, HIDDEN_SIZE, ACTION_SIZE
    w1, b1, w2, b2 = init_params(kp, S, H, A)
    kparams = prepare_kernel_params(w1, b1, w2, b2)

    # Module-native shapes (batch=2, state=4 -> hidden=32 -> 2 actions),
    # forced through the Pallas kernel so it is exercised at small sizes too.
    x_small = jax.random.normal(kx, (batch, S), jnp.float32)
    probs_small = policy_forward_pallas(x_small, kparams)
    jax.block_until_ready(probs_small)

    # Larger batch hits the tiled grid path (B=1024 -> TB=512, grid=(2,)).
    x_big = jax.random.normal(kb, (1024, S), jnp.float32)
    probs_big = policy_forward(x_big, kparams)          # dispatcher -> Pallas
    jax.block_until_ready(probs_big)

    # Dispatcher fallback for tiny batches (fused pure-XLA path).
    probs_small_xla = policy_forward(x_small, kparams)
    jax.block_until_ready(probs_small_xla)

    # Correctness: reference fed the same bf16-quantized activations the
    # kernel streams (all other math is f32 in both).
    def ref(x, quantize_x=True):
        xq = x.astype(jnp.bfloat16).astype(jnp.float32) if quantize_x else x
        h = jnp.maximum(xq @ w1 + b1, 0.0)
        return jax.nn.softmax(h @ w2 + b2, axis=1)

    for probs, x in ((probs_small, x_small), (probs_big, x_big)):
        r = ref(x)
        assert probs.shape == r.shape
        assert bool(jnp.allclose(probs, r, atol=1e-4, rtol=1e-4))
        assert bool(jnp.allclose(jnp.sum(probs, axis=1), 1.0, atol=1e-5))
    assert bool(jnp.allclose(probs_small_xla, ref(x_small, quantize_x=False),
                             atol=1e-5, rtol=1e-5))

    print("KERNEL_OK")
</pallas_src>

<mosaic_0001>
module attributes {stable_mosaic.version = 11 : i64} {
  func.func @policy_kernel(%arg0: i32, %arg1: memref<128x4xbf16, #tpu.memory_space<vmem>>, %arg2: memref<32x4xf32, #tpu.memory_space<vmem>>, %arg3: memref<32x1xf32, #tpu.memory_space<vmem>>, %arg4: memref<2x32xf32, #tpu.memory_space<vmem>>, %arg5: memref<2x1xf32, #tpu.memory_space<vmem>>, %arg6: memref<2x128xf32, #tpu.memory_space<vmem>>) attributes {dimension_semantics = [#tpu.dimension_semantics<parallel>], iteration_bounds = array<i64: 1>, scalar_prefetch = 0 : i64, scratch_operands = 0 : i64, tpu.core_type = #tpu.core_type<tc>, window_params = [{transform_indices = @transform_0, window_bounds = array<i64: 128, 4>}, {pipeline_mode = #tpu.pipeline_mode<synchronous>, transform_indices = @transform_1, window_bounds = array<i64: 32, 4>}, {pipeline_mode = #tpu.pipeline_mode<synchronous>, transform_indices = @transform_2, window_bounds = array<i64: 32, 1>}, {pipeline_mode = #tpu.pipeline_mode<synchronous>, transform_indices = @transform_3, window_bounds = array<i64: 2, 32>}, {pipeline_mode = #tpu.pipeline_mode<synchronous>, transform_indices = @transform_4, window_bounds = array<i64: 2, 1>}, {transform_indices = @transform_5, window_bounds = array<i64: 2, 128>}]} {
    %c0 = arith.constant 0 : index
    %c0_0 = arith.constant 0 : index
    %0 = vector.load %arg1[%c0, %c0_0] : memref<128x4xbf16, #tpu.memory_space<vmem>>, vector<128x4xbf16>
    %1 = arith.extf %0 : vector<128x4xbf16> to vector<128x4xf32>
    %c0_1 = arith.constant 0 : index
    %c0_2 = arith.constant 0 : index
    %2 = vector.load %arg2[%c0_1, %c0_2] : memref<32x4xf32, #tpu.memory_space<vmem>>, vector<32x4xf32>
    %cst = arith.constant dense<0.000000e+00> : vector<32x128xf32>
    %3 = tpu.matmul %2, %1, %cst {dimension_numbers = #tpu.dot_dimension_numbers<[1], [1], [0], [0], [0, 0, 1, 0], [], []>} : vector<32x4xf32>, vector<128x4xf32>, vector<32x128xf32> -> vector<32x128xf32>
    %c0_3 = arith.constant 0 : index
    %c0_4 = arith.constant 0 : index
    %4 = vector.load %arg3[%c0_3, %c0_4] : memref<32x1xf32, #tpu.memory_space<vmem>>, vector<32x1xf32>
    %5 = vector.broadcast %4 : vector<32x1xf32> to vector<32x128xf32>
    %6 = arith.addf %3, %5 : vector<32x128xf32>
    %cst_5 = arith.constant 0.000000e+00 : f32
    %7 = vector.broadcast %cst_5 : f32 to vector<32x128xf32>
    %8 = arith.maximumf %6, %7 : vector<32x128xf32>
    %c0_6 = arith.constant 0 : index
    %c0_7 = arith.constant 0 : index
    %9 = vector.load %arg4[%c0_6, %c0_7] : memref<2x32xf32, #tpu.memory_space<vmem>>, vector<2x32xf32>
    %cst_8 = arith.constant dense<0.000000e+00> : vector<2x128xf32>
    %10 = tpu.matmul %9, %8, %cst_8 {dimension_numbers = #tpu.dot_dimension_numbers<[1], [0], [0], [1], [0, 0, 1, 1], [], []>} : vector<2x32xf32>, vector<32x128xf32>, vector<2x128xf32> -> vector<2x128xf32>
    %c0_9 = arith.constant 0 : index
    %c0_10 = arith.constant 0 : index
    %11 = vector.load %arg5[%c0_9, %c0_10] : memref<2x1xf32, #tpu.memory_space<vmem>>, vector<2x1xf32>
    %12 = vector.broadcast %11 : vector<2x1xf32> to vector<2x128xf32>
    %13 = arith.addf %10, %12 : vector<2x128xf32>
    %cst_11 = arith.constant dense<0xFF800000> : vector<128xf32>
    %14 = vector.multi_reduction <maximumf>, %13, %cst_11 [0] : vector<2x128xf32> to vector<128xf32>
    %15 = vector.shape_cast %14 : vector<128xf32> to vector<1x128xf32>
    %16 = vector.broadcast %15 : vector<1x128xf32> to vector<2x128xf32>
    %17 = arith.subf %13, %16 : vector<2x128xf32>
    %18 = math.exp %17 : vector<2x128xf32>
    %cst_12 = arith.constant dense<0.000000e+00> : vector<128xf32>
    %19 = vector.multi_reduction <add>, %18, %cst_12 [0] : vector<2x128xf32> to vector<128xf32>
    %20 = vector.shape_cast %19 : vector<128xf32> to vector<1x128xf32>
    %21 = tpu.reciprocal %20 : vector<1x128xf32> -> vector<1x128xf32>
    %22 = vector.broadcast %21 : vector<1x128xf32> to vector<2x128xf32>
    %23 = arith.mulf %18, %22 : vector<2x128xf32>
    %c0_13 = arith.constant 0 : index
    %c0_14 = arith.constant 0 : index
    %24 = vector.load %arg6[%c0_13, %c0_14] : memref<2x128xf32, #tpu.memory_space<vmem>>, vector<2x128xf32>
    tpu.vector_store %arg6[%c0_13, %c0_14], %23 {strides = array<i32>} : memref<2x128xf32, #tpu.memory_space<vmem>>, vector<2x128xf32>,
    return
  }
  func.func @transform_0(%arg0: i32) -> (i32, i32) {
    %c0_i32 = arith.constant 0 : i32
    %c0_i32_0 = arith.constant 0 : i32
    return %arg0, %c0_i32 : i32, i32
  }
  func.func @transform_1(%arg0: i32) -> (i32, i32) {
    %c0_i32 = arith.constant 0 : i32
    %c0_i32_0 = arith.constant 0 : i32
    %c0_i32_1 = arith.constant 0 : i32
    return %c0_i32, %c0_i32_0 : i32, i32
  }
  func.func @transform_2(%arg0: i32) -> (i32, i32) {
    %c0_i32 = arith.constant 0 : i32
    %c0_i32_0 = arith.constant 0 : i32
    %c0_i32_1 = arith.constant 0 : i32
    return %c0_i32, %c0_i32_0 : i32, i32
  }
  func.func @transform_3(%arg0: i32) -> (i32, i32) {
    %c0_i32 = arith.constant 0 : i32
    %c0_i32_0 = arith.constant 0 : i32
    %c0_i32_1 = arith.constant 0 : i32
    return %c0_i32, %c0_i32_0 : i32, i32
  }
  func.func @transform_4(%arg0: i32) -> (i32, i32) {
    %c0_i32 = arith.constant 0 : i32
    %c0_i32_0 = arith.constant 0 : i32
    %c0_i32_1 = arith.constant 0 : i32
    return %c0_i32, %c0_i32_0 : i32, i32
  }
  func.func @transform_5(%arg0: i32) -> (i32, i32) {
    %c0_i32 = arith.constant 0 : i32
    %c0_i32_0 = arith.constant 0 : i32
    return %c0_i32, %arg0 : i32, i32
  }
}

</mosaic_0001>

<bundles_post_ra>
// kernel: _policy_forward_pallas_impl.1
= control target key start
LH: loop header
LB: loop body
LE: loop exit
PB: predicated region body
PF: predicated region fallthrough
CT: control target
= control target key end

     0   :  { %vm80_vm0 = vcmask 31744   ;;  %v534_v3 = vmov 0   ;;  %v535_v19 = vmov 0.0|0.0   ;;  %vm536_vm2 = vmmov 0   ;;  %s667_s0 = inlined_call_operand.vmem [shape: bf16[128,4], index: 0, kind: input, shape index: {}]   ;;  %s668_s1 = inlined_call_operand.vmem [shape: f32[32,4], index: 1, kind: input, shape index: {}]   ;;  %s669_s2 = inlined_call_operand.vmem [shape: f32[32,1], index: 2, kind: input, shape index: {}]   ;;  %s670_s4 = inlined_call_operand.vmem [shape: f32[2,1], index: 4, kind: input, shape index: {}]   ;;  %s671_s3 = inlined_call_operand.vmem [shape: f32[2,32], index: 3, kind: input, shape index: {}]   ;;  %s672_s5 = inlined_call_operand.vmem [shape: f32[2,128], index: 5, kind: output, shape index: {}]  }
   0x1   :  { %v358_v0 = vld [vmem:[%s667_s0] sm:$0xff]   ;;  %vm573_vm1 = vmpackc.low %vm80_vm0, %vm80_vm0  ;;  %v389_v2 = vld [vmem:[%s667_s0 + $0x8] sm:$0xff]   ;;  %528 = vset.pattern.permute.xlu0 %v534_v3  ;;  %529 = vset.pattern.permute.xlu1 %v534_v3  ;;  %v537_v20 = vmov 0.0   ;;  %vm237_vm3 = vcmask 261120   ;;  %vm311_vm4 = vcmask 1041408  }
   0x2   :  { %472 = vmatprep.subr.msk.bf16.mxu0 %vm573_vm1, %v358_v0  ;;  %v52_v4 = vld [vmem:[%s668_s1] sm:$0xff]  ;;  %v58_v6 = vld [vmem:[%s669_s2 + $0x10] sm:$0xff]  ;;  %v57_v7 = vld [vmem:[%s669_s2 + $0x8] sm:$0xff]  ;;  %518 = vmatprep.subr.bf16.mxu1 %v535_v19 }
   0x3   :  { %475 = vmatpush3.bf16.xpose.msk.msra.mxu0 %vm573_vm1, %v358_v0  ;;  %453 = vmatprep.mubr.msk.f32.mxu0 %vm80_vm0, %v52_v4  ;;  %v56_v5 = vld [vmem:[%s669_s2] sm:$0xff]  ;;  %v59_v8 = vld [vmem:[%s669_s2 + $0x18] sm:$0xff]  ;;  %v390_v9 = vld [vmem:[%s667_s0 + $0x10] sm:$0xff]  }
   0x4   :  { %478 = vmatprep.subr.msk.bf16.mxu0 %vm573_vm1, %v389_v2  ;;  %62 = vperm.xlu0 %528, %v56_v5   ;;  %v231_v10 = vld [vmem:[%s670_s4] sm:$0x3]  ;;  %v391_v11 = vld [vmem:[%s667_s0 + $0x18] sm:$0xff]   ;;  %v393_v13 = vld [vmem:[%s667_s0 + $0x28] sm:$0xff]  }
   0x5   :  { %72 = vperm.xlu1 %529, %v58_v6   ;;  %v392_v12 = vld [vmem:[%s667_s0 + $0x20] sm:$0xff]   ;;  %v394_v14 = vld [vmem:[%s667_s0 + $0x30] sm:$0xff]   ;;  %v395_v15 = vld [vmem:[%s667_s0 + $0x38] sm:$0xff]   ;;  %467 = vmatprep.mubr.msk.f32.mxu1 %vm536_vm2, %v537_v20 }
   0x6   :  { %v53_v16 = vld [vmem:[%s668_s1 + $0x8] sm:$0xff]  ;;  %v54_v17 = vld [vmem:[%s668_s1 + $0x10] sm:$0xff]  ;;  %v55_v18 = vld [vmem:[%s668_s1 + $0x18] sm:$0xff] }
   0x7   :  { %v230_v39 = vld [vmem:[%s671_s3] sm:$0x3] }
   0x8   :  { %67 = vperm.xlu0 %528, %v57_v7  }
   0x9   :  { %77 = vperm.xlu1 %529, %v59_v8  }
   0xb   :  { %481 = vmatpush3.bf16.xpose.msk.msra.mxu0 %vm573_vm1, %v389_v2 }
   0xc   :  { %484 = vmatprep.subr.msk.bf16.mxu0 %vm573_vm1, %v390_v9  ;;  %234 = vperm.xlu0 %528, %v231_v10  }
  0x13   :  { %487 = vmatpush3.bf16.xpose.msk.msra.mxu0 %vm573_vm1, %v390_v9 }
  0x14   :  { %490 = vmatprep.subr.msk.bf16.mxu0 %vm573_vm1, %v391_v11 }
  0x1b   :  { %493 = vmatpush3.bf16.xpose.msk.msra.mxu0 %vm573_vm1, %v391_v11 }
  0x1c   :  { %496 = vmatprep.subr.msk.bf16.mxu0 %vm573_vm1, %v392_v12 }
  0x23   :  { %499 = vmatpush3.bf16.xpose.msk.msra.mxu0 %vm573_vm1, %v392_v12 }
  0x24   :  { %502 = vmatprep.subr.msk.bf16.mxu0 %vm573_vm1, %v393_v13 }
  0x2b   :  { %505 = vmatpush3.bf16.xpose.msk.msra.mxu0 %vm573_vm1, %v393_v13 }
  0x2c   :  { %508 = vmatprep.subr.msk.bf16.mxu0 %vm573_vm1, %v394_v14 }
  0x33   :  { %511 = vmatpush3.bf16.xpose.msk.msra.mxu0 %vm573_vm1, %v394_v14 }
  0x34   :  { %514 = vmatprep.subr.msk.bf16.mxu0 %vm573_vm1, %v395_v15 }
  0x3b   :  { %517 = vmatpush3.bf16.xpose.msk.msra.mxu0 %vm573_vm1, %v395_v15 }
  0x42   :  { %454 = vmatmul.mubr.msk.f32.vlgmr.msra.gmra.mrb[0].mxu0 %vm80_vm0, %v53_v16 }
  0x43   :  { %456 = vmatprep.mubr.msk.f32.mxu0 %vm80_vm0, %v54_v17 }
  0x46   :  { %457 = vmatmul.mubr.msk.f32.gmra.mrb[2].mxu0 %vm80_vm0, %v55_v18 }
  0x83   :  { %v63_v21 = vpop.permute.xlu0 %62 }
  0x84   :  { %v73_v22 = vpop.permute.xlu1 %72 }
  0x87   :  { %v68_v23 = vpop.permute.xlu0 %67 }
  0x88   :  { %v78_v29 = vpop.permute.xlu1 %77 }
  0x8b   :  { %v235_v40 = vpop.permute.xlu0 %234 }
 0x115   :  { %v455_v24 = vpop.f32.mrb[0].mxu0 }
 0x116   :  { %v213_v25 = vadd.f32 %v455_v24, %v68_v23  ;;  %v207_v26 = vpop.f32.mrb[1].mxu0 }
 0x117   :  { %v208_v27 = vadd.f32 %v207_v26, %v63_v21 }
 0x118   :  { %v227_v28 = vmax.f32 %v213_v25, 0.0 }
 0x119   :  { %v226_v30 = vmax.f32 %v208_v27, 0.0  ;;  %v458_v31 = vpop.f32.mrb[2].mxu0 }
 0x11a   :  { %v223_v32 = vadd.f32 %v458_v31, %v78_v29  ;;  %v217_v33 = vpop.f32.mrb[3].mxu0 }
 0x11b   :  { %v218_v34 = vadd.f32 %v217_v33, %v73_v22  ;;  %v519_v35 = vpack.c.bf16 %v227_v28, %v226_v30 }
 0x11c   :  { %v229_v36 = vmax.f32 %v223_v32, 0.0 }
 0x11d   :  { %v228_v37 = vmax.f32 %v218_v34, 0.0  ;;  %520 = vmatpush3.bf16.msra.mxu1 %v519_v35 }
 0x11e   :  { %521 = vmatprep.subr.bf16.mxu1 %v535_v19 }
 0x11f   :  { %v522_v38 = vpack.c.bf16 %v229_v36, %v228_v37 }
 0x121   :  { %523 = vmatpush3.bf16.msra.mxu1 %v522_v38 }
 0x124   :  { %468 = vmatmul.mubr.msk.f32.vlgmr.msra.gmra.mrb[0].mxu1 %vm237_vm3, %v230_v39 }
 0x1f7   :  { %v307_v41 = vpop.f32.mrb[0].mxu1 }
 0x1f8   :  { %v308_v42 = vadd.f32 %v307_v41, %v235_v40  ;;  %v469_v43 = vpop.f32.mrb[1].mxu1 }
 0x1fa   :  { %v312_v44 = vsel %vm311_vm4, %v308_v42, -inf }
 0x1fb   :  { %v313_v45 = vrot.slane %v312_v44, 4 }
 0x1fd   :  { %v314_v46 = vmax.f32 %v312_v44, %v313_v45 }
 0x1ff   :  { %v315_v47 = vrot.slane %v314_v46, 2 }
 0x201   :  { %v316_v48 = vmax.f32 %v314_v46, %v315_v47 }
 0x203   :  { %v317_v49 = vrot.slane %v316_v48, 1 }
 0x205   :  { %v318_v50 = vmax.f32 %v316_v48, %v317_v49 }
 0x207   :  { %v319_v51 = vsub.f32 %v308_v42, %v318_v50 }
 0x209   :  { %v320_v52 = vmul.f32 1.442695, %v319_v51 }
 0x20b   :  { %530 = vpow2.f32 %v320_v52 }
 0x215   :  { %v531_v53 = vpop.eup %530 }
 0x216   :  { %v322_v54 = vsel %vm311_vm4, %v531_v53, 0.0 }
 0x217   :  { %v323_v55 = vrot.slane %v322_v54, 4 }
 0x219   :  { %v324_v56 = vadd.f32 %v323_v55, %v322_v54 }
 0x21b   :  { %v325_v57 = vrot.slane %v324_v56, 2 }
 0x21d   :  { %v326_v58 = vadd.f32 %v325_v57, %v324_v56 }
 0x21f   :  { %v327_v59 = vrot.slane %v326_v58, 1 }
 0x221   :  { %v328_v60 = vadd.f32 %v327_v59, %v326_v58 }
 0x223   :  { %532 = vrcp.f32 %v328_v60 }
 0x22d   :  { %v533_v61 = vpop.eup %532 }
 0x22e   :  { %v330_v62 = vmul.f32 %v533_v61, %v531_v53 }
 0x230   :  { %331 = vst [vmem:[%s672_s5] sm:$0x3] %v330_v62 }

</bundles_post_ra>
